<compile_context>
chip_gen: v5e
topology: v5e:2x2
jax: 0.10.0
libtpu: 0.0.40
codegen_flags: <defaults>
</compile_context>

<pallas_src>
import math

import jax
import jax.numpy as jnp
from jax.experimental import pallas as pl
from jax.experimental.pallas import tpu as pltpu

_LANE = 128
_SUBLANE = 8


def _round_up(x, m):
    return ((x + m - 1) // m) * m


def _me_dense_kernel(p_ref, conf_ref, ls_ref, lh_ref, out_ref):
    # p_ref:    [6] f32 in SMEM: [w_conf, w_exp, w_ls(=w2+w4), w_lh(=w3-w4), w_ratio, bias]
    # conf_ref: [br, 128] f32 in VMEM
    # ls_ref:   [br, 128] int32 (or f32) in VMEM
    # lh_ref:   [br, 128] int32 (or f32) in VMEM
    # out_ref:  [br, 128] f32 in VMEM
    conf = conf_ref[...]
    ls = ls_ref[...].astype(jnp.float32)   # cast in-kernel: free VPU work under the DMA bound
    lh = lh_ref[...].astype(jnp.float32)

    w_conf = p_ref[0]
    w_exp = p_ref[1]
    w_ls = p_ref[2]
    w_lh = p_ref[3]
    w_ratio = p_ref[4]
    bias = p_ref[5]

    # Exact division for parity with torch; kernel is HBM-bound so this is free.
    ratio = ls / lh

    logits = (
        w_conf * conf
        + w_exp * jnp.exp(conf)
        + w_ls * ls
        + w_lh * lh
        + w_ratio * ratio
        + bias
    )
    out_ref[...] = jax.nn.sigmoid(logits)


def me_model_baseline_dense_forward(conf, len_src, len_hyp, weight, bias, *, block_rows=2048):
    """conf: [B] f32; len_src/len_hyp: [B] (int or float); weight: [1,6]; bias: [1].

    Returns [B, 1] f32 (same as the PyTorch module's output).
    """
    B = conf.shape[0]
    conf = conf.astype(jnp.float32)

    # Lane-dense packing: batch goes on the 128-wide lane axis, rows on the sublane axis.
    rows_needed = max(pl.cdiv(B, _LANE), 1)
    rows_aligned = _round_up(rows_needed, _SUBLANE)
    br = min(block_rows, rows_aligned)
    if rows_aligned >= 2 * _SUBLANE and rows_aligned <= br:
        # Whole batch would be a single grid step: split into 2 so the "parallel" axis can
        # shard across v7x's 2 TensorCores (no-op penalty on single-TC v5e/v6e).
        br = _round_up(pl.cdiv(rows_aligned, 2), _SUBLANE)
    rows_total = _round_up(rows_aligned, br)
    Bp = rows_total * _LANE
    pad = Bp - B

    if pad:
        conf_p = jnp.pad(conf, (0, pad))
        ls_p = jnp.pad(len_src, (0, pad))
        # Pad len_hyp with 1 (not 0) so the padded lanes never divide by zero.
        lh_p = jnp.pad(len_hyp, (0, pad), constant_values=1)
    else:
        conf_p, ls_p, lh_p = conf, len_src, len_hyp

    conf_p = conf_p.reshape(rows_total, _LANE)
    ls_p = ls_p.reshape(rows_total, _LANE)
    lh_p = lh_p.reshape(rows_total, _LANE)

    # Fold the (ls - lh) term into the ls / lh weights on the host.
    w = weight.astype(jnp.float32).reshape(6)
    b = bias.astype(jnp.float32).reshape(1)
    params = jnp.stack([w[0], w[1], w[2] + w[4], w[3] - w[4], w[5], b[0]])  # [6] f32, tiny

    # Per-step block bytes: 4 planes * br * 128 * 4B (~4 MiB at br=2048); ~8 MiB double
    # buffered -> comfortably inside the 32 MiB scoped VMEM on all of v5e/v6e/v7x.
    out = pl.pallas_call(
        _me_dense_kernel,
        out_shape=jax.ShapeDtypeStruct((rows_total, _LANE), jnp.float32),
        grid=(rows_total // br,),
        in_specs=[
            pl.BlockSpec(memory_space=pltpu.MemorySpace.SMEM),
            pl.BlockSpec((br, _LANE), lambda i: (i, 0)),
            pl.BlockSpec((br, _LANE), lambda i: (i, 0)),
            pl.BlockSpec((br, _LANE), lambda i: (i, 0)),
        ],
        out_specs=pl.BlockSpec((br, _LANE), lambda i: (i, 0)),
        compiler_params=pltpu.CompilerParams(
            dimension_semantics=("parallel",),
            vmem_limit_bytes=32 * 1024 * 1024,
        ),
    )(params, conf_p, ls_p, lh_p)

    # TODO(synk): the pad/reshape/slice wrapper copies could be removed entirely with a
    # memory_space=pl.ANY + scalar-prefetched-B manual-DMA variant if B is often not a
    # multiple of 128 and this path ever dominates.
    return out.reshape(-1)[:B].reshape(B, 1)


def init_params(key):
    """torch.nn.Linear(6, 1) default init: U(-1/sqrt(6), 1/sqrt(6)) for weight and bias."""
    kw, kb = jax.random.split(key)
    bound = 1.0 / math.sqrt(6.0)
    weight = jax.random.uniform(kw, (1, 6), jnp.float32, -bound, bound)
    bias = jax.random.uniform(kb, (1,), jnp.float32, -bound, bound)
    return weight, bias


def _reference(conf, len_src, len_hyp, weight, bias):
    ls = len_src.astype(jnp.float32)
    lh = len_hyp.astype(jnp.float32)
    x = jnp.stack([conf, jnp.exp(conf), ls, lh, ls - lh, ls / lh], axis=-1)
    return jax.nn.sigmoid(x @ weight.T + bias)


if __name__ == "__main__":
    key = jax.random.PRNGKey(0)
    k_params, k_conf, k_src, k_hyp = jax.random.split(key, 4)

    weight, bias = init_params(k_params)

    # Small deterministic synthetic "sents": conf is a log-prob-like negative float,
    # len_src / len_hyp are positive word counts.
    B = 8
    conf = -jax.random.uniform(k_conf, (B,), jnp.float32, 0.1, 3.0)
    len_src = jax.random.randint(k_src, (B,), 3, 20).astype(jnp.int32)
    len_hyp = jax.random.randint(k_hyp, (B,), 3, 20).astype(jnp.int32)

    out = me_model_baseline_dense_forward(conf, len_src, len_hyp, weight, bias)
    out = jax.block_until_ready(out)
    ref = _reference(conf, len_src, len_hyp, weight, bias)
    assert out.shape == (B, 1)
    # Exact division is used in-kernel now, so parity with the reference is tight.
    assert jnp.allclose(out, ref, atol=1e-6), (out, ref)

    # Second check with a multi-block grid (block_rows=8 -> grid of 2) to exercise the
    # pipelined "parallel" grid axis and the padded tail.
    B2 = 2000
    k2a, k2b, k2c = jax.random.split(jax.random.PRNGKey(1), 3)
    conf2 = -jax.random.uniform(k2a, (B2,), jnp.float32, 0.1, 3.0)
    ls2 = jax.random.randint(k2b, (B2,), 3, 40).astype(jnp.int32)
    lh2 = jax.random.randint(k2c, (B2,), 3, 40).astype(jnp.int32)
    out2 = me_model_baseline_dense_forward(conf2, ls2, lh2, weight, bias, block_rows=8)
    out2 = jax.block_until_ready(out2)
    ref2 = _reference(conf2, ls2, lh2, weight, bias)
    assert out2.shape == (B2, 1)
    assert jnp.allclose(out2, ref2, atol=1e-6)

    print("KERNEL_OK")
</pallas_src>

<mosaic_0001>
module attributes {stable_mosaic.version = 11 : i64} {
  func.func @_me_dense_kernel(%arg0: i32, %arg1: memref<6xf32, #tpu.memory_space<smem>>, %arg2: memref<8x128xf32, #tpu.memory_space<vmem>>, %arg3: memref<8x128xi32, #tpu.memory_space<vmem>>, %arg4: memref<8x128xi32, #tpu.memory_space<vmem>>, %arg5: memref<8x128xf32, #tpu.memory_space<vmem>>) attributes {dimension_semantics = [#tpu.dimension_semantics<parallel>], iteration_bounds = array<i64: 1>, scalar_prefetch = 0 : i64, scratch_operands = 0 : i64, tpu.core_type = #tpu.core_type<tc>, window_params = [{transform_indices = @transform_0, window_bounds = array<i64: 6>}, {transform_indices = @transform_1, window_bounds = array<i64: 8, 128>}, {transform_indices = @transform_2, window_bounds = array<i64: 8, 128>}, {transform_indices = @transform_3, window_bounds = array<i64: 8, 128>}, {transform_indices = @transform_4, window_bounds = array<i64: 8, 128>}]} {
    %c0 = arith.constant 0 : index
    %c0_0 = arith.constant 0 : index
    %0 = vector.load %arg2[%c0, %c0_0] : memref<8x128xf32, #tpu.memory_space<vmem>>, vector<8x128xf32>
    %c0_1 = arith.constant 0 : index
    %c0_2 = arith.constant 0 : index
    %1 = vector.load %arg3[%c0_1, %c0_2] : memref<8x128xi32, #tpu.memory_space<vmem>>, vector<8x128xi32>
    %2 = arith.sitofp %1 : vector<8x128xi32> to vector<8x128xf32>
    %c0_3 = arith.constant 0 : index
    %c0_4 = arith.constant 0 : index
    %3 = vector.load %arg4[%c0_3, %c0_4] : memref<8x128xi32, #tpu.memory_space<vmem>>, vector<8x128xi32>
    %4 = arith.sitofp %3 : vector<8x128xi32> to vector<8x128xf32>
    %c0_5 = arith.constant 0 : index
    %5 = memref.load %arg1[%c0_5] : memref<6xf32, #tpu.memory_space<smem>>
    %c1 = arith.constant 1 : index
    %6 = memref.load %arg1[%c1] : memref<6xf32, #tpu.memory_space<smem>>
    %c2 = arith.constant 2 : index
    %7 = memref.load %arg1[%c2] : memref<6xf32, #tpu.memory_space<smem>>
    %c3 = arith.constant 3 : index
    %8 = memref.load %arg1[%c3] : memref<6xf32, #tpu.memory_space<smem>>
    %c4 = arith.constant 4 : index
    %9 = memref.load %arg1[%c4] : memref<6xf32, #tpu.memory_space<smem>>
    %c5 = arith.constant 5 : index
    %10 = memref.load %arg1[%c5] : memref<6xf32, #tpu.memory_space<smem>>
    %11 = arith.divf %2, %4 : vector<8x128xf32>
    %12 = vector.broadcast %5 : f32 to vector<8x128xf32>
    %13 = arith.mulf %12, %0 : vector<8x128xf32>
    %14 = math.exp %0 : vector<8x128xf32>
    %15 = vector.broadcast %6 : f32 to vector<8x128xf32>
    %16 = arith.mulf %15, %14 : vector<8x128xf32>
    %17 = arith.addf %13, %16 : vector<8x128xf32>
    %18 = vector.broadcast %7 : f32 to vector<8x128xf32>
    %19 = arith.mulf %18, %2 : vector<8x128xf32>
    %20 = arith.addf %17, %19 : vector<8x128xf32>
    %21 = vector.broadcast %8 : f32 to vector<8x128xf32>
    %22 = arith.mulf %21, %4 : vector<8x128xf32>
    %23 = arith.addf %20, %22 : vector<8x128xf32>
    %24 = vector.broadcast %9 : f32 to vector<8x128xf32>
    %25 = arith.mulf %24, %11 : vector<8x128xf32>
    %26 = arith.addf %23, %25 : vector<8x128xf32>
    %27 = vector.broadcast %10 : f32 to vector<8x128xf32>
    %28 = arith.addf %26, %27 : vector<8x128xf32>
    %29 = arith.negf %28 : vector<8x128xf32>
    %30 = math.exp %29 : vector<8x128xf32>
    %cst = arith.constant 1.000000e+00 : f32
    %31 = vector.broadcast %cst : f32 to vector<8x128xf32>
    %32 = arith.addf %31, %30 : vector<8x128xf32>
    %33 = arith.divf %31, %32 : vector<8x128xf32>
    %c0_6 = arith.constant 0 : index
    %c0_7 = arith.constant 0 : index
    %34 = vector.load %arg5[%c0_6, %c0_7] : memref<8x128xf32, #tpu.memory_space<vmem>>, vector<8x128xf32>
    tpu.vector_store %arg5[%c0_6, %c0_7], %33 {strides = array<i32>} : memref<8x128xf32, #tpu.memory_space<vmem>>, vector<8x128xf32>,
    return
  }
  func.func @transform_0(%arg0: i32) -> i32 {
    %c0_i32 = arith.constant 0 : i32
    %c0_i32_0 = arith.constant 0 : i32
    return %c0_i32 : i32
  }
  func.func @transform_1(%arg0: i32) -> (i32, i32) {
    %c0_i32 = arith.constant 0 : i32
    %c0_i32_0 = arith.constant 0 : i32
    return %arg0, %c0_i32 : i32, i32
  }
  func.func @transform_2(%arg0: i32) -> (i32, i32) {
    %c0_i32 = arith.constant 0 : i32
    %c0_i32_0 = arith.constant 0 : i32
    return %arg0, %c0_i32 : i32, i32
  }
  func.func @transform_3(%arg0: i32) -> (i32, i32) {
    %c0_i32 = arith.constant 0 : i32
    %c0_i32_0 = arith.constant 0 : i32
    return %arg0, %c0_i32 : i32, i32
  }
  func.func @transform_4(%arg0: i32) -> (i32, i32) {
    %c0_i32 = arith.constant 0 : i32
    %c0_i32_0 = arith.constant 0 : i32
    return %arg0, %c0_i32 : i32, i32
  }
}

</mosaic_0001>

<bundles_post_ra>
// kernel: tpu_custom_call.1
= control target key start
LH: loop header
LB: loop body
LE: loop exit
PB: predicated region body
PF: predicated region fallthrough
CT: control target
= control target key end

     0   :  { %9 = vsyncpa [#allocation5], 0  ;;  %s335_s0 = inlined_call_operand.hbm [shape: f32[6], index: 0, kind: input, shape index: {}]   ;;  %s336_s1 = inlined_call_operand.hbm [shape: f32[8,128], index: 1, kind: input, shape index: {}]   ;;  %s337_s2 = inlined_call_operand.hbm [shape: s32[8,128], index: 2, kind: input, shape index: {}]   ;;  %s338_s3 = inlined_call_operand.hbm [shape: s32[8,128], index: 3, kind: input, shape index: {}]   ;;  %s339_s4 = inlined_call_operand.hbm [shape: f32[8,128], index: 4, kind: output, shape index: {}]  }
   0x1   :  { %10 = vsyncpa [#allocation3], 0 }
   0x2   :  { %11 = vsyncpa [#allocation8], 0  ;;  %s38_s17 = sshll.u32 %s337_s2, 4  ;;  %s39_s17 = int_to_ptr.hbm [resolvable:$true] %s38_s17 }
   0x3   :  { %12 = vsyncpa [#allocation4], 0  ;;  %s290_s18 = smov [#allocation7]   ;;  %s18_s22 = sshll.u32 %s335_s0, 4  ;;  %s19_s22 = int_to_ptr.hbm [resolvable:$true] %s18_s22 }
   0x4   :  { %s40_s19 = sshll.u32 %s290_s18, 4  ;;  %s291_s23 = smov [#allocation2]   ;;  %s41_s19 = int_to_ptr.vmem [resolvable:$true] %s40_s19 }
   0x5   :  { %43 = dma.hbm_to_vmem [thread:$0]  %s39_s17, 128, %s41_s19, [#allocation8]  }
   0x6   :  { %21 = dma.hbm_to_smem %s19_s22, 16, %s291_s23, [#allocation5]  }
   0x7   :  { %s27_s26 = sshll.u32 %s336_s1, 4  ;;  %s292_s27 = smov [#allocation6]   ;;  %s28_s26 = int_to_ptr.hbm [resolvable:$true] %s27_s26 }
   0x8   :  { %s29_s2 = sshll.u32 %s292_s27, 4  ;;  %s49_s30 = sshll.u32 %s338_s3, 4  ;;  %s30_s2 = int_to_ptr.vmem [resolvable:$true] %s29_s2  ;;  %s50_s30 = int_to_ptr.hbm [resolvable:$true] %s49_s30 }
   0x9   :  { %32 = dma.hbm_to_vmem [thread:$0]  %s28_s26, 128, %s30_s2, [#allocation3]  }
   0xa   :  { %s293_s5 = smov [#allocation9]  }
   0xb   :  { %s51_s0 = sshll.u32 %s293_s5, 4  ;;  %s52_s0 = int_to_ptr.vmem [resolvable:$true] %s51_s0 }
   0xc   :  { %54 = dma.hbm_to_vmem [thread:$0]  %s50_s30, 128, %s52_s0, [#allocation8]  }
   0xd   :  { %282 = dma.done.wait [#allocation5], 16  }
   0xe   :  { %283 = vsyncadd [#allocation5], 4294967280 }
   0xf   :  { %284 = dma.done.wait [#allocation3], 128  }
  0x10   :  { %285 = vsyncadd [#allocation3], 4294967168 }
  0x11   :  { %286 = dma.done.wait [#allocation8], 256  }
  0x12   :  { %287 = vsyncadd [#allocation8], 4294967040 }
  0x13   :  { %71 = sfence }
  0x14   :  { %v72_v0 = vld [vmem:[#allocation6] sm:$0xff]  ;;  %v75_v1 = vld [vmem:[#allocation9] sm:$0xff]  ;;  %s77_s1 = sld [smem:[#allocation2]]  ;;  %v73_v4 = vld [vmem:[#allocation7] sm:$0xff]  ;;  %s294_s10 = smov [#allocation10]  }
  0x15   :  { %v76_v2 = vcvt.s32.f32 %v75_v1  ;;  %s155_s6 = sld [smem:[#allocation2 + $0x1]]  ;;  %v100_v3 = vmul.f32 1.442695, %v72_v0  ;;  %v74_v6 = vcvt.s32.f32 %v73_v4  ;;  %s141_s11 = sshll.u32 %s294_s10, 4  ;;  %s142_s11 = int_to_ptr.vmem [resolvable:$true] %s141_s11 }
  0x16   :  { %s156_s3 = sld [smem:[#allocation2 + $0x2]]  ;;  %s143_s14 = sshll.u32 %s339_s4, 4  ;;  %s144_s14 = int_to_ptr.hbm [resolvable:$true] %s143_s14 }
  0x17   :  { %166 = vrcp.f32 %v76_v2  ;;  %s157_s7 = sld [smem:[#allocation2 + $0x3]]  ;;  %vm88_vm0 = vweird.f32 %v76_v2  ;;  %v94_v13 = vand.u32 2147483648, %v76_v2  ;;  %v92_v16 = vand.u32 2147483647, %v76_v2 }
  0x18   :  { %168 = vpow2.f32 %v100_v3  ;;  %s158_s8 = sld [smem:[#allocation2 + $0x4]] }
  0x19   :  { %s159_s9 = sld [smem:[#allocation2 + $0x5]]  ;;  %v95_v21 = vor.u32 1.1754944e-38, %v94_v13  ;;  %vm93_vm3 = vcmp.eq.f32.partialorder %v92_v16, 8.507059e+37 }
  0x1a   :  { %v98_v5 = vstv %s77_s1 }
  0x1b   :  { %v102_v7 = vstv %s155_s6  ;;  %v99_v9 = vmul.f32 %v98_v5, %v72_v0 }
  0x1c   :  { %v105_v10 = vstv %s156_s3 }
  0x1d   :  { %v167_v8 = vpop.eup %166  ;;  %v106_v17 = vmul.f32 %v105_v10, %v74_v6  ;;  %v108_v19 = vstv %s157_s7 }
  0x1e   :  { %v169_v11 = vpop.eup %168  ;;  %v84_v12 = vmul.f32 %v167_v8, %v76_v2  ;;  %vm89_vm1 = vweird.f32 %v167_v8  ;;  %v109_v24 = vmul.f32 %v108_v19, %v76_v2  ;;  %v111_v27 = vstv %s158_s8 }
  0x1f   :  { %v103_v14 = vmul.f32 %v169_v11, %v102_v7  ;;  %vm90_vm2 = vmor %vm88_vm0, %vm89_vm1  ;;  %v114_v31 = vstv %s159_s9 }
  0x20   :  { %v85_v15 = vsub.f32 1.0, %v84_v12 }
  0x21   :  { %v104_v18 = vadd.f32 %v103_v14, %v99_v9 }
  0x22   :  { %v86_v20 = vmul.f32 %v167_v8, %v85_v15 }
  0x23   :  { %v107_v23 = vadd.f32 %v106_v17, %v104_v18 }
  0x24   :  { %v87_v22 = vadd.f32 %v167_v8, %v86_v20 }
  0x25   :  { %v110_v29 = vadd.f32 %v109_v24, %v107_v23 }
  0x26   :  { %v91_v25 = vsel %vm90_vm2, %v167_v8, %v87_v22 }
  0x27   :  { %v96_v26 = vsel %vm93_vm3, %v95_v21, %v91_v25 }
  0x28   :  { %v97_v28 = vmul.f32 %v96_v26, %v74_v6 }
  0x2a   :  { %v112_v30 = vmul.f32 %v111_v27, %v97_v28 }
  0x2c   :  { %v113_v32 = vadd.f32 %v112_v30, %v110_v29 }
  0x2e   :  { %v115_v33 = vadd.f32 %v114_v31, %v113_v32 }
  0x30   :  { %v160_v34 = vmul.f32 -1.442695, %v115_v33 }
  0x32   :  { %170 = vpow2.f32 %v160_v34 }
  0x38   :  { %v171_v35 = vpop.eup %170 }
  0x39   :  { %v119_v36 = vadd.f32 1.0, %v171_v35 }
  0x3b   :  { %172 = vrcp.f32 %v119_v36  ;;  %v131_v39 = vand.u32 2147483648, %v119_v36  ;;  %vm125_vm4 = vweird.f32 %v119_v36  ;;  %v129_v41 = vand.u32 2147483647, %v119_v36 }
  0x3d   :  { %v132_v43 = vor.u32 1.1754944e-38, %v131_v39  ;;  %vm130_vm7 = vcmp.eq.f32.partialorder %v129_v41, 8.507059e+37 }
  0x41   :  { %v173_v37 = vpop.eup %172 }
  0x42   :  { %v121_v38 = vmul.f32 %v173_v37, %v119_v36  ;;  %vm126_vm5 = vweird.f32 %v173_v37 }
  0x43   :  { %vm127_vm6 = vmor %vm125_vm4, %vm126_vm5 }
  0x44   :  { %v122_v40 = vsub.f32 1.0, %v121_v38 }
  0x46   :  { %v123_v42 = vmul.f32 %v173_v37, %v122_v40 }
  0x48   :  { %v124_v44 = vadd.f32 %v173_v37, %v123_v42 }
  0x4a   :  { %v128_v45 = vsel %vm127_vm6, %v173_v37, %v124_v44 }
  0x4b   :  { %v133_v46 = vsel %vm130_vm7, %v132_v43, %v128_v45 }
  0x4c   :  { %135 = vst [vmem:[#allocation10] sm:$0xff] %v133_v46 }
  0x4d   :  { %146 = dma.vmem_to_hbm [thread:$0]  %s142_s11, 128, %s144_s14, [#allocation4]  }
  0x4e   :  { %288 = dma.done.wait [#allocation4], 128  }
  0x4f   :  { %289 = vsyncadd [#allocation4], 4294967168 }
  0x50   :  { %151 = vsyncpa [#allocation3], 1 }
  0x51   :  { %152 = vsyncpa [#allocation8], 1 }
  0x52   :  { %153 = vsyncpa [#allocation4], 1 }
  0x53   :  { %154 = vsyncpa [#allocation5], 1 }

</bundles_post_ra>
